<compile_context>
chip_gen: v7x
topology: tpu7x:2x2x1
jax: 0.10.0
libtpu: 0.0.40
codegen_flags: <defaults>
</compile_context>

<pallas_src>
import jax
import jax.numpy as jnp
from jax.experimental import pallas as pl
from jax.experimental.pallas import tpu as pltpu


def _bag_kernel(p_ref, i_ref, d_ref, o_ref):
    # Elementwise gated blend:  out = i + sigmoid(d) * (p - i)
    p = p_ref[...].astype(jnp.float32)
    i = i_ref[...].astype(jnp.float32)
    d = d_ref[...].astype(jnp.float32)
    att = jax.nn.sigmoid(d)                      # EUP transcendental
    o_ref[...] = (i + att * (p - i)).astype(o_ref.dtype)


def bag(p, i, d, *, target_block_rows=1024):
    """Pallas TPU implementation of Bag: sigmoid(d) * p + (1 - sigmoid(d)) * i."""
    assert p.shape == i.shape == d.shape, "p, i, d must have the same shape"
    orig_shape = p.shape
    out_dtype = jnp.result_type(p.dtype, i.dtype, d.dtype)
    total = int(p.size)

    LANES = 128
    SUBLANES = 8

    # Repack to a lane-dense (rows, 128) slab; rows padded to a whole number of
    # equally-sized blocks (block_rows is a multiple of 8 for (8,128) tiling).
    rows = -(-total // LANES)
    rows = -(-rows // SUBLANES) * SUBLANES
    block_rows = max(SUBLANES, min(target_block_rows, rows) // SUBLANES * SUBLANES)
    rows = -(-rows // block_rows) * block_rows
    padded_total = rows * LANES

    def to2d(x):
        flat = jnp.reshape(x, (-1,)).astype(out_dtype)
        if padded_total != total:
            flat = jnp.pad(flat, (0, padded_total - total))
        return jnp.reshape(flat, (rows, LANES))

    p2, i2, d2 = to2d(p), to2d(i), to2d(d)

    spec = pl.BlockSpec((block_rows, LANES), lambda r: (r, 0))

    out2d = pl.pallas_call(
        _bag_kernel,
        out_shape=jax.ShapeDtypeStruct((rows, LANES), out_dtype),
        grid_spec=pltpu.PrefetchScalarGridSpec(
            num_scalar_prefetch=0,
            grid=(rows // block_rows,),
            in_specs=[spec, spec, spec],
            out_specs=spec,
        ),
        compiler_params=pltpu.CompilerParams(
            dimension_semantics=("parallel",),
            vmem_limit_bytes=64 * 1024 * 1024,
        ),
    )(p2, i2, d2)

    return jnp.reshape(jnp.reshape(out2d, (-1,))[:total], orig_shape)


def _reference(p, i, d):
    att = jax.nn.sigmoid(d)
    return att * p + (1.0 - att) * i


if __name__ == "__main__":
    key = jax.random.PRNGKey(0)
    kp, ki, kd = jax.random.split(key, 3)

    shape = (2, 4, 16, 16)   # (batch, channels, H, W)
    p = jax.random.normal(kp, shape, dtype=jnp.float32)
    i = jax.random.normal(ki, shape, dtype=jnp.float32)
    d = jax.random.normal(kd, shape, dtype=jnp.float32)

    out = bag(p, i, d)
    out = jax.block_until_ready(out)

    ref = _reference(p, i, d)
    assert out.shape == shape
    assert jnp.max(jnp.abs(out - ref)) < 1e-5

    print("KERNEL_OK")
</pallas_src>

<mosaic_0001>
module attributes {stable_mosaic.version = 11 : i64} {
  func.func @_bag_kernel(%arg0: i32, %arg1: memref<16x128xf32, #tpu.memory_space<vmem>>, %arg2: memref<16x128xf32, #tpu.memory_space<vmem>>, %arg3: memref<16x128xf32, #tpu.memory_space<vmem>>, %arg4: memref<16x128xf32, #tpu.memory_space<vmem>>) attributes {dimension_semantics = [#tpu.dimension_semantics<parallel>], iteration_bounds = array<i64: 1>, scalar_prefetch = 0 : i64, scratch_operands = 0 : i64, tpu.core_type = #tpu.core_type<tc>, window_params = [{transform_indices = @transform_0, window_bounds = array<i64: 16, 128>}, {transform_indices = @transform_1, window_bounds = array<i64: 16, 128>}, {transform_indices = @transform_2, window_bounds = array<i64: 16, 128>}, {transform_indices = @transform_3, window_bounds = array<i64: 16, 128>}]} {
    %c0 = arith.constant 0 : index
    %c0_0 = arith.constant 0 : index
    %0 = vector.load %arg1[%c0, %c0_0] : memref<16x128xf32, #tpu.memory_space<vmem>>, vector<16x128xf32>
    %c0_1 = arith.constant 0 : index
    %c0_2 = arith.constant 0 : index
    %1 = vector.load %arg2[%c0_1, %c0_2] : memref<16x128xf32, #tpu.memory_space<vmem>>, vector<16x128xf32>
    %c0_3 = arith.constant 0 : index
    %c0_4 = arith.constant 0 : index
    %2 = vector.load %arg3[%c0_3, %c0_4] : memref<16x128xf32, #tpu.memory_space<vmem>>, vector<16x128xf32>
    %3 = arith.negf %2 : vector<16x128xf32>
    %4 = math.exp %3 : vector<16x128xf32>
    %cst = arith.constant 1.000000e+00 : f32
    %5 = vector.broadcast %cst : f32 to vector<16x128xf32>
    %6 = arith.addf %5, %4 : vector<16x128xf32>
    %7 = arith.divf %5, %6 : vector<16x128xf32>
    %8 = arith.subf %0, %1 : vector<16x128xf32>
    %9 = arith.mulf %7, %8 : vector<16x128xf32>
    %10 = arith.addf %1, %9 : vector<16x128xf32>
    %c0_5 = arith.constant 0 : index
    %c0_6 = arith.constant 0 : index
    %11 = vector.load %arg4[%c0_5, %c0_6] : memref<16x128xf32, #tpu.memory_space<vmem>>, vector<16x128xf32>
    tpu.vector_store %arg4[%c0_5, %c0_6], %10 {strides = array<i32>} : memref<16x128xf32, #tpu.memory_space<vmem>>, vector<16x128xf32>,
    return
  }
  func.func @transform_0(%arg0: i32) -> (i32, i32) {
    %c0_i32 = arith.constant 0 : i32
    %c0_i32_0 = arith.constant 0 : i32
    return %arg0, %c0_i32 : i32, i32
  }
  func.func @transform_1(%arg0: i32) -> (i32, i32) {
    %c0_i32 = arith.constant 0 : i32
    %c0_i32_0 = arith.constant 0 : i32
    return %arg0, %c0_i32 : i32, i32
  }
  func.func @transform_2(%arg0: i32) -> (i32, i32) {
    %c0_i32 = arith.constant 0 : i32
    %c0_i32_0 = arith.constant 0 : i32
    return %arg0, %c0_i32 : i32, i32
  }
  func.func @transform_3(%arg0: i32) -> (i32, i32) {
    %c0_i32 = arith.constant 0 : i32
    %c0_i32_0 = arith.constant 0 : i32
    return %arg0, %c0_i32 : i32, i32
  }
}

</mosaic_0001>

<bundles_post_ra>
// kernel: tpu_custom_call.1
= control target key start
LH: loop header
LB: loop body
LE: loop exit
PB: predicated region body
PF: predicated region fallthrough
CT: control target
= control target key end

     0   :  { %8 = vsyncpa [#allocation3], 0  ;;  %s303_s0 = inlined_call_operand.hbm [shape: f32[16,128], index: 0, kind: input, shape index: {}]   ;;  %s304_s1 = inlined_call_operand.hbm [shape: f32[16,128], index: 1, kind: input, shape index: {}]   ;;  %s305_s2 = inlined_call_operand.hbm [shape: f32[16,128], index: 2, kind: input, shape index: {}]   ;;  %s306_s3 = inlined_call_operand.hbm [shape: f32[16,128], index: 3, kind: output, shape index: {}]  }
   0x1   :  { %9 = vsyncpa [#allocation6], 0 }
   0x2   :  { %10 = vsyncpa [#allocation4], 0  ;;  %s210_s12 = smov [#allocation5]   ;;  %s211_s14 = smov [#allocation2]  }
   0x3   :  { %s28_s13 = sshll.u32 %s210_s12, 4  ;;  %s16_s15 = sshll.u32 %s211_s14, 4  ;;  %s29_s13 = int_to_ptr.vmem [resolvable:$true] %s28_s13  ;;  %s236_s15 = int_to_ptr.vmem [resolvable:$true] %s16_s15 }
   0x4   :  { %s116_s18 = scalar_lea.hbm %s304_s1, 256 }
   0x5   :  { %p117_p0 = scmp.ne.s32.totalorder %s304_s1, %s116_s18  ;;  %p120_p1 = scmp.lt.u32.totalorder %s116_s18, %s304_s1 }
   0x7   :  { %p122_p2 = pnand %p120_p1, %p117_p0 }
   0x9   :  { %125 = shalt.err (!%p122_p2)
}
   0xa   :  { %s126_s23 = scalar_lea.vmem %s29_s13, 256  ;;  %p131_p4 = scmp.lt.s32.totalorder %s29_s13, %s29_s13 }
   0xb   :  { %p127_p3 = scmp.ne.s32.totalorder %s29_s13, %s126_s23  ;;  %p132_p5 = scmp.lt.s32.totalorder %s126_s23, %s126_s23 }
   0xd   :  { %p133_p6 = por %p132_p5, %p131_p4 }
   0xf   :  { %p134_p7 = pnand %p133_p6, %p127_p3 }
  0x11   :  { %137 = shalt.err (!%p134_p7)
}
  0x12   :  { %s212_s24 = smov 128   ;;  %s213_s25 = smov 8  }
  0x13   :  { %34 = dma.hbm_to_vmem [thread:$0]  %s304_s1, 256, %s29_s13, [#allocation6], %s212_s24, %s212_s24, %s213_s25  }
  0x14   :  { %s138_s30 = scalar_lea.hbm %s303_s0, 256 }
  0x15   :  { %p139_p8 = scmp.ne.s32.totalorder %s303_s0, %s138_s30  ;;  %p142_p9 = scmp.lt.u32.totalorder %s138_s30, %s303_s0 }
  0x17   :  { %p144_p10 = pnand %p142_p9, %p139_p8 }
  0x19   :  { %147 = shalt.err (!%p144_p10)
}
  0x1a   :  { %s148_s8 = scalar_lea.vmem %s236_s15, 256  ;;  %p153_p12 = scmp.lt.s32.totalorder %s236_s15, %s236_s15 }
  0x1b   :  { %p149_p11 = scmp.ne.s32.totalorder %s236_s15, %s148_s8  ;;  %p154_p13 = scmp.lt.s32.totalorder %s148_s8, %s148_s8 }
  0x1d   :  { %p155_p0 = por %p154_p13, %p153_p12 }
  0x1f   :  { %p156_p1 = pnand %p155_p0, %p149_p11 }
  0x21   :  { %159 = shalt.err (!%p156_p1)
}
  0x22   :  { %22 = dma.hbm_to_vmem [thread:$0]  %s303_s0, 256, %s236_s15, [#allocation3], %s212_s24, %s212_s24, %s213_s25  }
  0x23   :  { %s214_s10 = smov [#allocation7]   ;;  %s160_s14 = scalar_lea.hbm %s305_s2, 256 }
  0x24   :  { %s40_s11 = sshll.u32 %s214_s10, 4  ;;  %p161_p2 = scmp.ne.s32.totalorder %s305_s2, %s160_s14  ;;  %s41_s11 = int_to_ptr.vmem [resolvable:$true] %s40_s11 }
  0x25   :  { %p164_p3 = scmp.lt.u32.totalorder %s160_s14, %s305_s2 }
  0x27   :  { %p166_p4 = pnand %p164_p3, %p161_p2 }
  0x29   :  { %169 = shalt.err (!%p166_p4)
}
  0x2a   :  { %s170_s20 = scalar_lea.vmem %s41_s11, 256  ;;  %p175_p6 = scmp.lt.s32.totalorder %s41_s11, %s41_s11 }
  0x2b   :  { %p171_p5 = scmp.ne.s32.totalorder %s41_s11, %s170_s20  ;;  %p176_p7 = scmp.lt.s32.totalorder %s170_s20, %s170_s20 }
  0x2d   :  { %p177_p8 = por %p176_p7, %p175_p6 }
  0x2f   :  { %p178_p9 = pnand %p177_p8, %p171_p5 }
  0x31   :  { %181 = shalt.err (!%p178_p9)
}
  0x32   :  { %46 = dma.hbm_to_vmem [thread:$0]  %s305_s2, 256, %s41_s11, [#allocation6], %s212_s24, %s212_s24, %s213_s25  }
  0x33   :  { %204 = dma.done.wait [#allocation3], 256  }
  0x34   :  { %205 = vsyncadd [#allocation3], 4294967040 }
  0x35   :  { %206 = dma.done.wait [#allocation6], 512  }
  0x36   :  { %207 = vsyncadd [#allocation6], 4294966784  ;;  %v60_v0 = vld [vmem:[#allocation7] sm:$0xff]  ;;  %v61_v2 = vld [vmem:[#allocation7 + $0x8] sm:$0xff]  ;;  %s215_s2 = smov [#allocation8]  }
  0x37   :  { %v100_v1 = vmul.f32 -1.442695, %v60_v0  ;;  %v101_v3 = vmul.f32 -1.442695, %v61_v2  ;;  %v56_v8 = vld [vmem:[#allocation2] sm:$0xff]  ;;  %v58_v9 = vld [vmem:[#allocation5] sm:$0xff] }
  0x38   :  { %v57_v10 = vld [vmem:[#allocation2 + $0x8] sm:$0xff]  ;;  %v59_v11 = vld [vmem:[#allocation5 + $0x8] sm:$0xff]  ;;  %v74_v12 = vsub.f32 %v56_v8, %v58_v9  ;;  %s87_s21 = sshll.u32 %s215_s2, 4  ;;  %s88_s21 = int_to_ptr.vmem [resolvable:$true] %s87_s21 }
  0x39   :  { %108 = vpow2.f32 %v100_v1  ;;  %v75_v13 = vsub.f32 %v57_v10, %v59_v11  ;;  %s182_s22 = scalar_lea.vmem %s88_s21, 256  ;;  %p187_p11 = scmp.lt.s32.totalorder %s88_s21, %s88_s21 }
  0x3a   :  { %110 = vpow2.f32 %v101_v3  ;;  %p183_p10 = scmp.ne.s32.totalorder %s88_s21, %s182_s22  ;;  %p188_p12 = scmp.lt.s32.totalorder %s182_s22, %s182_s22 }
  0x3c   :  { %p189_p13 = por %p188_p12, %p187_p11 }
  0x3e   :  { %p190_p0 = pnand %p189_p13, %p183_p10 }
  0x43   :  { %v109_v4 = vpop.eup %108 }
  0x44   :  { %v111_v5 = vpop.eup %110  ;;  %v68_v6 = vadd.f32 1.0, %v109_v4 }
  0x45   :  { %v69_v7 = vadd.f32 1.0, %v111_v5 }
  0x46   :  { %112 = vrcp.f32 %v68_v6 }
  0x47   :  { %114 = vrcp.f32 %v69_v7 }
  0x50   :  { %v113_v14 = vpop.eup %112 }
  0x51   :  { %v115_v15 = vpop.eup %114  ;;  %v76_v16 = vmul.f32 %v113_v14, %v74_v12 }
  0x52   :  { %v77_v17 = vmul.f32 %v115_v15, %v75_v13 }
  0x53   :  { %v78_v18 = vadd.f32 %v76_v16, %v58_v9 }
  0x54   :  { %v79_v19 = vadd.f32 %v77_v17, %v59_v11 }
  0x55   :  { %80 = vst [vmem:[#allocation8] sm:$0xff] %v78_v18 }
  0x56   :  { %81 = vst [vmem:[#allocation8 + $0x8] sm:$0xff] %v79_v19 }
  0x57   :  { %193 = shalt.err (!%p190_p0)
}
  0x58   :  { %s194_s27 = scalar_lea.hbm %s306_s3, 256 }
  0x59   :  { %p195_p1 = scmp.ne.s32.totalorder %s306_s3, %s194_s27  ;;  %p198_p2 = scmp.lt.u32.totalorder %s194_s27, %s306_s3 }
  0x5b   :  { %p200_p3 = pnand %p198_p2, %p195_p1 }
  0x5d   :  { %203 = shalt.err (!%p200_p3)
}
  0x5e   :  { %93 = dma.vmem_to_hbm [thread:$0]  %s88_s21, 256, %s306_s3, [#allocation4], %s212_s24, %s212_s24, %s213_s25  }
  0x5f   :  { %208 = dma.done.wait [#allocation4], 256  }
  0x60   :  { %209 = vsyncadd [#allocation4], 4294967040 }
  0x61   :  { %97 = vsyncpa [#allocation3], 1 }
  0x62   :  { %98 = vsyncpa [#allocation6], 1 }
  0x63   :  { %99 = vsyncpa [#allocation4], 1 }

</bundles_post_ra>
